<compile_context>
chip_gen: v7x
topology: tpu7x:2x2x1
jax: 0.10.0
libtpu: 0.0.40
codegen_flags: <defaults>
</compile_context>

<pallas_src>
import math

import jax
import jax.numpy as jnp
from jax.experimental import pallas as pl
from jax.experimental.pallas import tpu as pltpu

_HIDDEN = 512
_LANE = 128


def _round_up(n, m):
    return ((n + m - 1) // m) * m


# --------------------------------------------------------------------------
# Kernel
# --------------------------------------------------------------------------
def _encoder_kernel(x_ref, w0_ref, w1_ref, wh_ref, out_ref):
    """relu(x@W0) -> dropout(eval: identity) -> relu(@W1) -> @[Wm|Wv]."""
    h0 = jnp.dot(x_ref[...], w0_ref[...], preferred_element_type=jnp.float32)
    # Dropout(0.5) in eval (inference) mode == identity.
    # TODO(synk): training-mode dropout would use pltpu.prng_seed +
    # pltpu.prng_random_bits on the h0 tile here instead of a separate JAX op.
    h0 = jnp.maximum(h0, 0.0).astype(jnp.bfloat16)
    h1 = jnp.maximum(
        jnp.dot(h0, w1_ref[...], preferred_element_type=jnp.float32), 0.0
    ).astype(jnp.bfloat16)
    # Fused means/log_vars head: one MXU matmul, one lane-dense 128-wide store.
    out_ref[...] = jnp.dot(h1, wh_ref[...], preferred_element_type=jnp.float32)


# --------------------------------------------------------------------------
# One-time weight packing (call at init / load time, NOT per forward call)
# --------------------------------------------------------------------------
def pack_params(params):
    """Packs raw f32 [in, out] weights into the kernel's layout.

      * casts matmul weights to bf16 (f32 accumulation happens in-kernel),
      * fuses the means / log_var heads into one [512, head_pad] matrix,
        padded up to a multiple of 128 lanes for an unmasked store.
    """
    latent = params["wm"].shape[1]
    head = 2 * latent
    head_pad = _round_up(max(head, _LANE), _LANE)
    w_heads = jnp.concatenate([params["wm"], params["wv"]], axis=1)
    w_heads = jnp.pad(w_heads, ((0, 0), (0, head_pad - head)))
    packed = {
        "w0": params["w0"].astype(jnp.bfloat16),
        "w1": params["w1"].astype(jnp.bfloat16),
        "w_heads": w_heads.astype(jnp.bfloat16),
    }
    return packed, latent


# --------------------------------------------------------------------------
# Batch tiling heuristic
# --------------------------------------------------------------------------
def _choose_tm(B, tm_max):
    # Small batch: a single tile, rounded to the bf16 sublane pack (16 rows).
    if B <= 256:
        return min(_round_up(B, 16), _round_up(tm_max, 16))
    # Larger batch: big tiles amortize the ~0.35 us per-grid-step overhead,
    # but keep >= 4 grid steps so both v7x TensorCores get work and DMA /
    # compute overlap; 256-row granularity matches the v6e/v7x MXU M dim.
    tm = _round_up(pl.cdiv(B, 4), 256)
    return min(tm_max, max(256, tm))


# --------------------------------------------------------------------------
# Forward wrapper
# --------------------------------------------------------------------------
def encoder_forward(x, c, weights, latent_size, *, conditional=True,
                    training=False, tm_max=1024):
    """x: [B, x_dim] f32; c: [B, condition_dim] f32 or None.

    `weights` is the dict returned by `pack_params`.
    Returns (means, log_vars), each [B, latent_size] f32.
    """
    if training:
        # TODO(synk): only eval-mode dropout (identity) is implemented.
        raise NotImplementedError(
            "training-mode Dropout(0.5) not implemented in the Pallas kernel")

    B = x.shape[0]
    head = 2 * latent_size

    xb = x.astype(jnp.bfloat16)
    if conditional:
        xb = jnp.concatenate([xb, c.astype(jnp.bfloat16)], axis=-1)
    in_dim = xb.shape[1]

    w0 = weights["w0"]
    w1 = weights["w1"]
    wh = weights["w_heads"]
    assert w0.shape == (in_dim, _HIDDEN)
    head_pad = wh.shape[1]

    tm = _choose_tm(B, tm_max)
    b_pad = _round_up(B, tm)
    if b_pad != B:
        xb = jnp.pad(xb, ((0, b_pad - B), (0, 0)))
    grid = (b_pad // tm,)

    def resident(w):
        # Constant index_map + single buffer: weight stays resident in VMEM,
        # no per-step re-DMA and no wasted double-buffer allocation.
        return pl.BlockSpec(w.shape, lambda i: (0, 0),
                            pipeline_mode=pl.Buffered(1))

    out = pl.pallas_call(
        _encoder_kernel,
        out_shape=jax.ShapeDtypeStruct((b_pad, head_pad), jnp.float32),
        grid=grid,
        in_specs=[pl.BlockSpec((tm, in_dim), lambda i: (i, 0)),
                  resident(w0), resident(w1), resident(wh)],
        out_specs=pl.BlockSpec((tm, head_pad), lambda i: (i, 0)),
        compiler_params=pltpu.CompilerParams(
            dimension_semantics=("parallel",),
            # Only raise the scoped-VMEM limit when the big-tile path needs
            # it (v5e default is 16 MiB); 32 MiB is safe on all generations.
            vmem_limit_bytes=(32 << 20) if tm >= 512 else None,
        ),
    )(xb, w0, w1, wh)

    means = out[:B, :latent_size]
    log_vars = out[:B, latent_size:head]
    return means, log_vars


# --------------------------------------------------------------------------
# Parameter init (mimics nn.Linear's kaiming-uniform bound)
# --------------------------------------------------------------------------
def init_params(key, x_dim, latent_size, conditional, condition_dim):
    """Weights stored as [in, out] (transposed w.r.t. PyTorch's [out, in])."""
    input_size = x_dim + (condition_dim if conditional else 0)
    ks = jax.random.split(key, 4)

    def linear_w(k, fan_in, fan_out):
        bound = 1.0 / math.sqrt(fan_in)
        return jax.random.uniform(k, (fan_in, fan_out),
                                  minval=-bound, maxval=bound,
                                  dtype=jnp.float32)

    return {
        "w0": linear_w(ks[0], input_size, _HIDDEN),
        "w1": linear_w(ks[1], _HIDDEN, _HIDDEN),
        "wm": linear_w(ks[2], _HIDDEN, latent_size),
        "wv": linear_w(ks[3], _HIDDEN, latent_size),
    }


if __name__ == "__main__":
    # Small shapes consistent with the module's forward.
    B = 2
    x_dim = 16
    condition_dim = 8
    latent_size = 8
    conditional = True

    root = jax.random.PRNGKey(0)
    kx, kc, kp = jax.random.split(root, 3)
    x = jax.random.normal(kx, (B, x_dim), dtype=jnp.float32)
    c = jax.random.normal(kc, (B, condition_dim), dtype=jnp.float32)
    raw_params = init_params(kp, x_dim, latent_size, conditional, condition_dim)

    # One-time packing (done at model load, outside the per-call path).
    packed, latent = pack_params(raw_params)

    fwd = jax.jit(
        encoder_forward,
        static_argnames=("latent_size", "conditional", "training", "tm_max"))
    means, log_vars = fwd(x, c, packed, latent_size=latent,
                          conditional=conditional)
    jax.block_until_ready((means, log_vars))

    # Plain-JAX reference mirroring the kernel's dtype strategy (bf16 matmul
    # inputs, f32 accumulation) so the comparison is apples-to-apples.
    xc = jnp.concatenate([x, c], axis=-1).astype(jnp.bfloat16)
    w0 = raw_params["w0"].astype(jnp.bfloat16)
    w1 = raw_params["w1"].astype(jnp.bfloat16)
    wm = raw_params["wm"].astype(jnp.bfloat16)
    wv = raw_params["wv"].astype(jnp.bfloat16)
    h0 = jnp.maximum(jnp.dot(xc, w0, preferred_element_type=jnp.float32), 0.0)
    h1 = jnp.maximum(jnp.dot(h0.astype(jnp.bfloat16), w1,
                             preferred_element_type=jnp.float32), 0.0)
    h1 = h1.astype(jnp.bfloat16)
    ref_means = jnp.dot(h1, wm, preferred_element_type=jnp.float32)
    ref_logvars = jnp.dot(h1, wv, preferred_element_type=jnp.float32)

    assert means.shape == (B, latent_size) and log_vars.shape == (B, latent_size)
    assert jnp.allclose(means, ref_means, atol=1e-2, rtol=1e-2)
    assert jnp.allclose(log_vars, ref_logvars, atol=1e-2, rtol=1e-2)

    print("KERNEL_OK")
</pallas_src>

<mosaic_0001>
module attributes {stable_mosaic.version = 11 : i64} {
  func.func @_encoder_kernel(%arg0: i32, %arg1: memref<16x24xbf16, #tpu.memory_space<vmem>>, %arg2: memref<24x512xbf16, #tpu.memory_space<vmem>>, %arg3: memref<512x512xbf16, #tpu.memory_space<vmem>>, %arg4: memref<512x128xbf16, #tpu.memory_space<vmem>>, %arg5: memref<16x128xf32, #tpu.memory_space<vmem>>) attributes {dimension_semantics = [#tpu.dimension_semantics<parallel>], iteration_bounds = array<i64: 1>, scalar_prefetch = 0 : i64, scratch_operands = 0 : i64, tpu.core_type = #tpu.core_type<tc>, window_params = [{transform_indices = @transform_0, window_bounds = array<i64: 16, 24>}, {pipeline_mode = #tpu.pipeline_mode<synchronous>, transform_indices = @transform_1, window_bounds = array<i64: 24, 512>}, {pipeline_mode = #tpu.pipeline_mode<synchronous>, transform_indices = @transform_2, window_bounds = array<i64: 512, 512>}, {pipeline_mode = #tpu.pipeline_mode<synchronous>, transform_indices = @transform_3, window_bounds = array<i64: 512, 128>}, {transform_indices = @transform_4, window_bounds = array<i64: 16, 128>}]} {
    %c0 = arith.constant 0 : index
    %c0_0 = arith.constant 0 : index
    %0 = vector.load %arg1[%c0, %c0_0] : memref<16x24xbf16, #tpu.memory_space<vmem>>, vector<16x24xbf16>
    %c0_1 = arith.constant 0 : index
    %c0_2 = arith.constant 0 : index
    %1 = vector.load %arg2[%c0_1, %c0_2] : memref<24x512xbf16, #tpu.memory_space<vmem>>, vector<24x512xbf16>
    %cst = arith.constant dense<0.000000e+00> : vector<16x512xf32>
    %2 = tpu.matmul %0, %1, %cst {dimension_numbers = #tpu.dot_dimension_numbers<[1], [0], [0], [1], [0, 0, 1, 1], [], []>} : vector<16x24xbf16>, vector<24x512xbf16>, vector<16x512xf32> -> vector<16x512xf32>
    %cst_3 = arith.constant 0.000000e+00 : f32
    %3 = vector.broadcast %cst_3 : f32 to vector<16x512xf32>
    %4 = arith.maximumf %2, %3 : vector<16x512xf32>
    %5 = arith.truncf %4 : vector<16x512xf32> to vector<16x512xbf16>
    %c0_4 = arith.constant 0 : index
    %c0_5 = arith.constant 0 : index
    %6 = vector.load %arg3[%c0_4, %c0_5] : memref<512x512xbf16, #tpu.memory_space<vmem>>, vector<512x512xbf16>
    %cst_6 = arith.constant dense<0.000000e+00> : vector<16x512xf32>
    %7 = tpu.matmul %5, %6, %cst_6 {dimension_numbers = #tpu.dot_dimension_numbers<[1], [0], [0], [1], [0, 0, 1, 1], [], []>} : vector<16x512xbf16>, vector<512x512xbf16>, vector<16x512xf32> -> vector<16x512xf32>
    %cst_7 = arith.constant 0.000000e+00 : f32
    %8 = vector.broadcast %cst_7 : f32 to vector<16x512xf32>
    %9 = arith.maximumf %7, %8 : vector<16x512xf32>
    %10 = arith.truncf %9 : vector<16x512xf32> to vector<16x512xbf16>
    %c0_8 = arith.constant 0 : index
    %c0_9 = arith.constant 0 : index
    %11 = vector.load %arg4[%c0_8, %c0_9] : memref<512x128xbf16, #tpu.memory_space<vmem>>, vector<512x128xbf16>
    %cst_10 = arith.constant dense<0.000000e+00> : vector<16x128xf32>
    %12 = tpu.matmul %10, %11, %cst_10 {dimension_numbers = #tpu.dot_dimension_numbers<[1], [0], [0], [1], [0, 0, 1, 1], [], []>} : vector<16x512xbf16>, vector<512x128xbf16>, vector<16x128xf32> -> vector<16x128xf32>
    %c0_11 = arith.constant 0 : index
    %c0_12 = arith.constant 0 : index
    %13 = vector.load %arg5[%c0_11, %c0_12] : memref<16x128xf32, #tpu.memory_space<vmem>>, vector<16x128xf32>
    tpu.vector_store %arg5[%c0_11, %c0_12], %12 {strides = array<i32>} : memref<16x128xf32, #tpu.memory_space<vmem>>, vector<16x128xf32>,
    return
  }
  func.func @transform_0(%arg0: i32) -> (i32, i32) {
    %c0_i32 = arith.constant 0 : i32
    %c0_i32_0 = arith.constant 0 : i32
    return %arg0, %c0_i32 : i32, i32
  }
  func.func @transform_1(%arg0: i32) -> (i32, i32) {
    %c0_i32 = arith.constant 0 : i32
    %c0_i32_0 = arith.constant 0 : i32
    %c0_i32_1 = arith.constant 0 : i32
    return %c0_i32, %c0_i32_0 : i32, i32
  }
  func.func @transform_2(%arg0: i32) -> (i32, i32) {
    %c0_i32 = arith.constant 0 : i32
    %c0_i32_0 = arith.constant 0 : i32
    %c0_i32_1 = arith.constant 0 : i32
    return %c0_i32, %c0_i32_0 : i32, i32
  }
  func.func @transform_3(%arg0: i32) -> (i32, i32) {
    %c0_i32 = arith.constant 0 : i32
    %c0_i32_0 = arith.constant 0 : i32
    %c0_i32_1 = arith.constant 0 : i32
    return %c0_i32, %c0_i32_0 : i32, i32
  }
  func.func @transform_4(%arg0: i32) -> (i32, i32) {
    %c0_i32 = arith.constant 0 : i32
    %c0_i32_0 = arith.constant 0 : i32
    return %arg0, %c0_i32 : i32, i32
  }
}

</mosaic_0001>

<bundles_post_ra>
// kernel: encoder_forward.1
= control target key start
LH: loop header
LB: loop body
LE: loop exit
PB: predicated region body
PF: predicated region fallthrough
CT: control target
= control target key end

     0   :  { %9 = vsyncpa [#allocation3], 0  ;;  %s2146_s0 = inlined_call_operand.vmem [shape: bf16[16,24], index: 0, kind: input, shape index: {}]   ;;  %s2147_s1 = inlined_call_operand.hbm [shape: bf16[24,512], index: 1, kind: input, shape index: {}]   ;;  %s2148_s2 = inlined_call_operand.hbm [shape: bf16[512,512], index: 2, kind: input, shape index: {}]   ;;  %s2149_s3 = inlined_call_operand.hbm [shape: bf16[512,128], index: 3, kind: input, shape index: {}]   ;;  %s2150_s4 = inlined_call_operand.vmem [shape: f32[16,128], index: 4, kind: output, shape index: {}]  }
   0x1   :  { %10 = vsyncpa [#allocation5], 0  ;;  %s2053_s15 = smov [#allocation4]   ;;  %s2054_s17 = smov [#allocation2]  }
   0x2   :  { %s30_s16 = sshll.u32 %s2053_s15, 4  ;;  %s18_s18 = sshll.u32 %s2054_s17, 4  ;;  %s31_s16 = int_to_ptr.vmem [resolvable:$true] %s30_s16  ;;  %s2086_s18 = int_to_ptr.vmem [resolvable:$true] %s18_s18 }
   0x3   :  { %s1983_s21 = scalar_lea.hbm %s2148_s2, 16384 }
   0x4   :  { %p1984_p0 = scmp.ne.s32.totalorder %s2148_s2, %s1983_s21  ;;  %p1987_p1 = scmp.lt.u32.totalorder %s1983_s21, %s2148_s2 }
   0x6   :  { %p1989_p2 = pnand %p1987_p1, %p1984_p0 }
   0x8   :  { %1992 = shalt.err (!%p1989_p2)
}
   0x9   :  { %s1993_s26 = scalar_lea.vmem %s31_s16, 16384  ;;  %p1998_p4 = scmp.lt.s32.totalorder %s31_s16, %s31_s16 }
   0xa   :  { %p1994_p3 = scmp.ne.s32.totalorder %s31_s16, %s1993_s26  ;;  %p1999_p5 = scmp.lt.s32.totalorder %s1993_s26, %s1993_s26 }
   0xc   :  { %p2000_p6 = por %p1999_p5, %p1998_p4 }
   0xe   :  { %p2001_p7 = pnand %p2000_p6, %p1994_p3 }
  0x10   :  { %2004 = shalt.err (!%p2001_p7)
}
  0x11   :  { %s2055_s27 = smov 256   ;;  %s2056_s28 = smov 16  }
  0x12   :  { %36 = dma.hbm_to_vmem [thread:$0]  %s2148_s2, 16384, %s31_s16, [#allocation5], %s2055_s27, %s2055_s27, %s2056_s28  }
  0x13   :  { %s2005_s7 = scalar_lea.hbm %s2147_s1, 768 }
  0x14   :  { %p2006_p8 = scmp.ne.s32.totalorder %s2147_s1, %s2005_s7  ;;  %p2009_p9 = scmp.lt.u32.totalorder %s2005_s7, %s2147_s1 }
  0x16   :  { %p2011_p10 = pnand %p2009_p9, %p2006_p8 }
  0x18   :  { %2014 = shalt.err (!%p2011_p10)
}
  0x19   :  { %s2015_s12 = scalar_lea.vmem %s2086_s18, 768  ;;  %p2020_p12 = scmp.lt.s32.totalorder %s2086_s18, %s2086_s18 }
  0x1a   :  { %p2016_p11 = scmp.ne.s32.totalorder %s2086_s18, %s2015_s12  ;;  %p2021_p13 = scmp.lt.s32.totalorder %s2015_s12, %s2015_s12 }
  0x1c   :  { %p2022_p0 = por %p2021_p13, %p2020_p12 }
  0x1e   :  { %p2023_p1 = pnand %p2022_p0, %p2016_p11 }
  0x20   :  { %2026 = shalt.err (!%p2023_p1)
}
  0x21   :  { %24 = dma.hbm_to_vmem [thread:$0]  %s2147_s1, 768, %s2086_s18, [#allocation3], %s2055_s27, %s2055_s27, %s2056_s28  }
  0x22   :  { %s2057_s14 = smov [#allocation6]   ;;  %s2027_s19 = scalar_lea.hbm %s2149_s3, 4096 }
  0x23   :  { %s42_s15 = sshll.u32 %s2057_s14, 4  ;;  %p2028_p2 = scmp.ne.s32.totalorder %s2149_s3, %s2027_s19  ;;  %s43_s15 = int_to_ptr.vmem [resolvable:$true] %s42_s15 }
  0x24   :  { %p2031_p3 = scmp.lt.u32.totalorder %s2027_s19, %s2149_s3 }
  0x26   :  { %p2033_p4 = pnand %p2031_p3, %p2028_p2 }
  0x28   :  { %2036 = shalt.err (!%p2033_p4)
}
  0x29   :  { %s2037_s24 = scalar_lea.vmem %s43_s15, 4096  ;;  %p2042_p6 = scmp.lt.s32.totalorder %s43_s15, %s43_s15 }
  0x2a   :  { %p2038_p5 = scmp.ne.s32.totalorder %s43_s15, %s2037_s24  ;;  %p2043_p7 = scmp.lt.s32.totalorder %s2037_s24, %s2037_s24 }
  0x2c   :  { %p2044_p8 = por %p2043_p7, %p2042_p6 }
  0x2e   :  { %p2045_p9 = pnand %p2044_p8, %p2038_p5 }
  0x30   :  { %2048 = shalt.err (!%p2045_p9)
}
  0x31   :  { %s2058_s1 = smov 64   ;;  %s2059_s18 = smov 4  }
  0x32   :  { %48 = dma.hbm_to_vmem [thread:$0]  %s2149_s3, 4096, %s43_s15, [#allocation5], %s2058_s1, %s2058_s1, %s2059_s18  }
  0x33   :  { %2049 = dma.done.wait [#allocation3], 768  }
  0x34   :  { %2050 = vsyncadd [#allocation3], 4294966528 }
  0x35   :  { %2051 = dma.done.wait [#allocation5], 20480  }
  0x36   :  { %2052 = vsyncadd [#allocation5], 4294946816  ;;  %v2060_v0 = vmov 0   ;;  %v1748_v1 = vld [vmem:[#allocation2 + $0x4] ss:$16 sps:$4 sm:$0xff]   ;;  %vm106_vm0 = vcmask 1043456  }
  0x37   :  { %151 = vmatprep.mubr.bf16.mxu0 %v2060_v0  ;;  %194 = vmatprep.mubr.bf16.mxu1 %v2060_v0  ;;  %v1750_v2 = vld [vmem:[#allocation2] ss:$16 sps:$4 sm:$0xff]   ;;  %v1754_v6 = vld [vmem:[#allocation2 + $0xc] ss:$16 sps:$4 sm:$0xff]   ;;  %v1756_v7 = vld [vmem:[#allocation2 + $0x8] ss:$16 sps:$4 sm:$0xff]  }
  0x38   :  { %v65_v3 = vld [vmem:[#allocation2 + $0x20] sm:$0xff]  ;;  %119 = vmatprep.subr.bf16.mxu0 %v1748_v1  ;;  %v66_v9 = vld [vmem:[#allocation2 + $0x28] sm:$0xff]  ;;  %162 = vmatprep.subr.bf16.mxu1 %v1754_v6  ;;  %vm102_vm1 = vcmask 195584  }
  0x39   :  { %v1521_v4 = vcombine.high %v65_v3, %v65_v3  ;;  %v1520_v5 = vcombine.low %v65_v3, %v65_v3  ;;  %120 = vmatpush1.bf16.msra.mxu0 %v1750_v2  ;;  %v1523_v10 = vcombine.high %v66_v9, %v66_v9  ;;  %v1522_v11 = vcombine.low %v66_v9, %v66_v9  ;;  %v1761_v12 = vld [vmem:[#allocation4 + $0x4] ss:$16 sps:$4 sm:$0xff]   ;;  %v1759_v14 = vld [vmem:[#allocation4] ss:$16 sps:$4 sm:$0xff]   ;;  %v1764_v16 = vld [vmem:[#allocation4 + $0xc] ss:$16 sps:$4 sm:$0xff]  }
  0x3a   :  { %v1753_v13 = vld [vmem:[%s2146_s0] sm:$0xff]   ;;  %163 = vmatpush1.bf16.msra.mxu1 %v1756_v7  ;;  %v1762_v18 = vld [vmem:[#allocation4 + $0x8] ss:$16 sps:$4 sm:$0xff]   ;;  %v1770_v20 = vld [vmem:[#allocation4 + $0x2c] ss:$16 sps:$4 sm:$0xff]  }
  0x3b   :  { %1524 = vmatprep.subr.msk.bf16.mxu0 %vm106_vm0, %v1521_v4  ;;  %v108_v8 = vsel %vm106_vm0, %v1520_v5, 0  ;;  %1526 = vmatprep.subr.msk.bf16.mxu1 %vm106_vm0, %v1523_v10  ;;  %v114_v15 = vsel %vm106_vm0, %v1522_v11, 0  ;;  %v1767_v17 = vld [vmem:[#allocation4 + $0x24] ss:$16 sps:$4 sm:$0xff]   ;;  %v1765_v19 = vld [vmem:[#allocation4 + $0x20] ss:$16 sps:$4 sm:$0xff]  }
  0x3c   :  { %v1773_v21 = vld [vmem:[#allocation4 + $0x44] ss:$16 sps:$4 sm:$0xff]   ;;  %v1768_v22 = vld [vmem:[#allocation4 + $0x28] ss:$16 sps:$4 sm:$0xff]   ;;  %v1771_v23 = vld [vmem:[#allocation4 + $0x40] ss:$16 sps:$4 sm:$0xff]  }
  0x3d   :  { %122 = vmatpush1.bf16.msra.mxu0 %v108_v8  ;;  %v1776_v24 = vld [vmem:[#allocation4 + $0x4c] ss:$16 sps:$4 sm:$0xff]   ;;  %v1779_v25 = vld [vmem:[#allocation4 + $0x64] ss:$16 sps:$4 sm:$0xff]   ;;  %v1774_v26 = vld [vmem:[#allocation4 + $0x48] ss:$16 sps:$4 sm:$0xff]  }
  0x3e   :  { %985 = vmatprep.subr.bf16.mxu0 %v1761_v12  ;;  %165 = vmatpush1.bf16.msra.mxu1 %v114_v15  ;;  %v1777_v27 = vld [vmem:[#allocation4 + $0x60] ss:$16 sps:$4 sm:$0xff]   ;;  %v1782_v28 = vld [vmem:[#allocation4 + $0x6c] ss:$16 sps:$4 sm:$0xff]   ;;  %v1785_v29 = vld [vmem:[#allocation4 + $0x84] ss:$16 sps:$4 sm:$0xff]  }
  0x3f   :  { %1071 = vmatprep.subr.bf16.mxu1 %v1764_v16  ;;  %v1780_v30 = vld [vmem:[#allocation4 + $0x68] ss:$16 sps:$4 sm:$0xff]   ;;  %v1783_v31 = vld [vmem:[#allocation4 + $0x80] ss:$16 sps:$4 sm:$0xff]   ;;  %v1788_v32 = vld [vmem:[#allocation4 + $0x8c] ss:$16 sps:$4 sm:$0xff]  }
  0x40   :  { %1525 = vmatmul.mubr.msk.bf16.vlgmr.msra.gmra.mrb[0].mxu0 %vm102_vm1, %v1753_v13  ;;  %v1791_v33 = vld [vmem:[#allocation4 + $0xa4] ss:$16 sps:$4 sm:$0xff]   ;;  %v1786_v34 = vld [vmem:[#allocation4 + $0x88] ss:$16 sps:$4 sm:$0xff]   ;;  %v1789_v35 = vld [vmem:[#allocation4 + $0xa0] ss:$16 sps:$4 sm:$0xff]  }
  0x41   :  { %986 = vmatpush1.bf16.msra.mxu0 %v1759_v14  ;;  %1527 = vmatmul.mubr.msk.bf16.vlgmr.msra.gmra.mrb[0].mxu1 %vm102_vm1, %v1753_v13  ;;  %v1794_v36 = vld [vmem:[#allocation4 + $0xac] ss:$16 sps:$4 sm:$0xff]   ;;  %v1797_v37 = vld [vmem:[#allocation4 + $0xc4] ss:$16 sps:$4 sm:$0xff]   ;;  %v1792_v38 = vld [vmem:[#allocation4 + $0xa8] ss:$16 sps:$4 sm:$0xff]  }
  0x42   :  { %987 = vmatprep.subr.bf16.mxu0 %v1767_v17  ;;  %1072 = vmatpush1.bf16.msra.mxu1 %v1762_v18  ;;  %v1795_v39 = vld [vmem:[#allocation4 + $0xc0] ss:$16 sps:$4 sm:$0xff]   ;;  %v1800_v40 = vld [vmem:[#allocation4 + $0xcc] ss:$16 sps:$4 sm:$0xff]   ;;  %v1803_v41 = vld [vmem:[#allocation4 + $0xe4] ss:$16 sps:$4 sm:$0xff]  }
  0x43   :  { %1073 = vmatprep.subr.bf16.mxu1 %v1770_v20  ;;  %v1798_v42 = vld [vmem:[#allocation4 + $0xc8] ss:$16 sps:$4 sm:$0xff]   ;;  %v1801_v43 = vld [vmem:[#allocation4 + $0xe0] ss:$16 sps:$4 sm:$0xff]   ;;  %v1806_v44 = vld [vmem:[#allocation4 + $0xec] ss:$16 sps:$4 sm:$0xff]  }
  0x44   :  { %v1809_v45 = vld [vmem:[#allocation4 + $0x104] ss:$16 sps:$4 sm:$0xff]   ;;  %v1804_v46 = vld [vmem:[#allocation4 + $0xe8] ss:$16 sps:$4 sm:$0xff]   ;;  %v1807_v47 = vld [vmem:[#allocation4 + $0x100] ss:$16 sps:$4 sm:$0xff]  }
  0x45   :  { %988 = vmatpush1.bf16.msra.mxu0 %v1765_v19  ;;  %v1812_v48 = vld [vmem:[#allocation4 + $0x10c] ss:$16 sps:$4 sm:$0xff]   ;;  %v1810_v49 = vld [vmem:[#allocation4 + $0x108] ss:$16 sps:$4 sm:$0xff]   ;;  %v1815_v50 = vld [vmem:[#allocation4 + $0x124] ss:$16 sps:$4 sm:$0xff]  }
  0x46   :  { %989 = vmatprep.subr.bf16.mxu0 %v1773_v21  ;;  %1074 = vmatpush1.bf16.msra.mxu1 %v1768_v22  ;;  %v1813_v51 = vld [vmem:[#allocation4 + $0x120] ss:$16 sps:$4 sm:$0xff]   ;;  %v1818_v52 = vld [vmem:[#allocation4 + $0x12c] ss:$16 sps:$4 sm:$0xff]   ;;  %v1821_v53 = vld [vmem:[#allocation4 + $0x144] ss:$16 sps:$4 sm:$0xff]  }
  0x47   :  { %1075 = vmatprep.subr.bf16.mxu1 %v1776_v24  ;;  %v1816_v54 = vld [vmem:[#allocation4 + $0x128] ss:$16 sps:$4 sm:$0xff]   ;;  %v1819_v55 = vld [vmem:[#allocation4 + $0x140] ss:$16 sps:$4 sm:$0xff]   ;;  %v1824_v56 = vld [vmem:[#allocation4 + $0x14c] ss:$16 sps:$4 sm:$0xff]  }
  0x48   :  { %v1827_v57 = vld [vmem:[#allocation4 + $0x164] ss:$16 sps:$4 sm:$0xff]   ;;  %v1822_v58 = vld [vmem:[#allocation4 + $0x148] ss:$16 sps:$4 sm:$0xff]   ;;  %v1825_v59 = vld [vmem:[#allocation4 + $0x160] ss:$16 sps:$4 sm:$0xff]  }
  0x49   :  { %990 = vmatpush1.bf16.msra.mxu0 %v1771_v23  ;;  %v1830_v60 = vld [vmem:[#allocation4 + $0x16c] ss:$16 sps:$4 sm:$0xff]   ;;  %v1833_v61 = vld [vmem:[#allocation4 + $0x184] ss:$16 sps:$4 sm:$0xff]   ;;  %v1828_v62 = vld [vmem:[#allocation4 + $0x168] ss:$16 sps:$4 sm:$0xff]  }
  0x4a   :  { %991 = vmatprep.subr.bf16.mxu0 %v1779_v25  ;;  %1076 = vmatpush1.bf16.msra.mxu1 %v1774_v26  ;;  %v1831_v63 = vld [vmem:[#allocation4 + $0x180] ss:$16 sps:$4 sm:$0xff]   ;;  %v1836_v0 = vld [vmem:[#allocation4 + $0x18c] ss:$16 sps:$4 sm:$0xff]   ;;  %v1839_v1 = vld [vmem:[#allocation4 + $0x1a4] ss:$16 sps:$4 sm:$0xff]  }
  0x4b   :  { %1077 = vmatprep.subr.bf16.mxu1 %v1782_v28  ;;  %v1834_v2 = vld [vmem:[#allocation4 + $0x188] ss:$16 sps:$4 sm:$0xff]   ;;  %v1837_v3 = vld [vmem:[#allocation4 + $0x1a0] ss:$16 sps:$4 sm:$0xff]   ;;  %v1842_v4 = vld [vmem:[#allocation4 + $0x1ac] ss:$16 sps:$4 sm:$0xff]  }
  0x4c   :  { %v1840_v5 = vld [vmem:[#allocation4 + $0x1a8] ss:$16 sps:$4 sm:$0xff]   ;;  %v1845_v6 = vld [vmem:[#allocation4 + $0x1c4] ss:$16 sps:$4 sm:$0xff]   ;;  %v1848_v7 = vld [vmem:[#allocation4 + $0x1cc] ss:$16 sps:$4 sm:$0xff]  }
  0x4d   :  { %992 = vmatpush1.bf16.msra.mxu0 %v1777_v27  ;;  %v1843_v8 = vld [vmem:[#allocation4 + $0x1c0] ss:$16 sps:$4 sm:$0xff]   ;;  %v1846_v9 = vld [vmem:[#allocation4 + $0x1c8] ss:$16 sps:$4 sm:$0xff]   ;;  %v1851_v10 = vld [vmem:[#allocation4 + $0x1e4] ss:$16 sps:$4 sm:$0xff]  }
  0x4e   :  { %993 = vmatprep.subr.bf16.mxu0 %v1785_v29  ;;  %1078 = vmatpush1.bf16.msra.mxu1 %v1780_v30  ;;  %v1854_v11 = vld [vmem:[#allocation4 + $0x1ec] ss:$16 sps:$4 sm:$0xff]   ;;  %v1849_v12 = vld [vmem:[#allocation4 + $0x1e0] ss:$16 sps:$4 sm:$0xff]   ;;  %v1852_v13 = vld [vmem:[#allocation4 + $0x1e8] ss:$16 sps:$4 sm:$0xff]  }
  0x4f   :  { %1079 = vmatprep.subr.bf16.mxu1 %v1788_v32  ;;  %v1857_v14 = vld [vmem:[#allocation4 + $0x204] ss:$16 sps:$4 sm:$0xff]   ;;  %v1860_v15 = vld [vmem:[#allocation4 + $0x20c] ss:$16 sps:$4 sm:$0xff]   ;;  %v1858_v32 = vld [vmem:[#allocation4 + $0x208] ss:$16 sps:$4 sm:$0xff]  }
  0x51   :  { %994 = vmatpush1.bf16.msra.mxu0 %v1783_v31  ;;  %v1855_v31 = vld [vmem:[#allocation4 + $0x200] ss:$16 sps:$4 sm:$0xff]  }
  0x52   :  { %995 = vmatprep.subr.bf16.mxu0 %v1791_v33  ;;  %1080 = vmatpush1.bf16.msra.mxu1 %v1786_v34 }
  0x53   :  { %1081 = vmatprep.subr.bf16.mxu1 %v1794_v36  ;;  %v1866_v36 = vld [vmem:[#allocation4 + $0x22c] ss:$16 sps:$4 sm:$0xff]  }
  0x55   :  { %996 = vmatpush1.bf16.msra.mxu0 %v1789_v35  ;;  %v1863_v35 = vld [vmem:[#allocation4 + $0x224] ss:$16 sps:$4 sm:$0xff]  }
  0x56   :  { %997 = vmatprep.subr.bf16.mxu0 %v1797_v37  ;;  %1082 = vmatpush1.bf16.msra.mxu1 %v1792_v38 }
  0x57   :  { %1083 = vmatprep.subr.bf16.mxu1 %v1800_v40  ;;  %v1861_v40 = vld [vmem:[#allocation4 + $0x220] ss:$16 sps:$4 sm:$0xff]  }
  0x59   :  { %998 = vmatpush1.bf16.msra.mxu0 %v1795_v39 }
  0x5a   :  { %999 = vmatprep.subr.bf16.mxu0 %v1803_v41  ;;  %1084 = vmatpush1.bf16.msra.mxu1 %v1798_v42  ;;  %v1864_v41 = vld [vmem:[#allocation4 + $0x228] ss:$16 sps:$4 sm:$0xff]   ;;  %v1869_v42 = vld [vmem:[#allocation4 + $0x244] ss:$16 sps:$4 sm:$0xff]  }
  0x5b   :  { %1085 = vmatprep.subr.bf16.mxu1 %v1806_v44  ;;  %v1867_v44 = vld [vmem:[#allocation4 + $0x240] ss:$16 sps:$4 sm:$0xff]  }
  0x5d   :  { %1000 = vmatpush1.bf16.msra.mxu0 %v1801_v43  ;;  %v1872_v43 = vld [vmem:[#allocation4 + $0x24c] ss:$16 sps:$4 sm:$0xff]  }
  0x5e   :  { %1001 = vmatprep.subr.bf16.mxu0 %v1809_v45  ;;  %1086 = vmatpush1.bf16.msra.mxu1 %v1804_v46  ;;  %v1870_v45 = vld [vmem:[#allocation4 + $0x248] ss:$16 sps:$4 sm:$0xff]   ;;  %v1875_v46 = vld [vmem:[#allocation4 + $0x264] ss:$16 sps:$4 sm:$0xff]  }
  0x5f   :  { %1087 = vmatprep.subr.bf16.mxu1 %v1812_v48  ;;  %v1873_v48 = vld [vmem:[#allocation4 + $0x260] ss:$16 sps:$4 sm:$0xff]  }
  0x61   :  { %1002 = vmatpush1.bf16.msra.mxu0 %v1807_v47  ;;  %v1878_v47 = vld [vmem:[#allocation4 + $0x26c] ss:$16 sps:$4 sm:$0xff]  }
  0x62   :  { %1003 = vmatprep.subr.bf16.mxu0 %v1815_v50  ;;  %1088 = vmatpush1.bf16.msra.mxu1 %v1810_v49  ;;  %v1876_v49 = vld [vmem:[#allocation4 + $0x268] ss:$16 sps:$4 sm:$0xff]   ;;  %v1881_v50 = vld [vmem:[#allocation4 + $0x284] ss:$16 sps:$4 sm:$0xff]  }
  0x63   :  { %1089 = vmatprep.subr.bf16.mxu1 %v1818_v52  ;;  %v1879_v52 = vld [vmem:[#allocation4 + $0x280] ss:$16 sps:$4 sm:$0xff]  }
  0x65   :  { %1004 = vmatpush1.bf16.msra.mxu0 %v1813_v51  ;;  %v1884_v51 = vld [vmem:[#allocation4 + $0x28c] ss:$16 sps:$4 sm:$0xff]  }
  0x66   :  { %1005 = vmatprep.subr.bf16.mxu0 %v1821_v53  ;;  %1090 = vmatpush1.bf16.msra.mxu1 %v1816_v54  ;;  %v1882_v53 = vld [vmem:[#allocation4 + $0x288] ss:$16 sps:$4 sm:$0xff]   ;;  %v1887_v54 = vld [vmem:[#allocation4 + $0x2a4] ss:$16 sps:$4 sm:$0xff]  }
  0x67   :  { %1091 = vmatprep.subr.bf16.mxu1 %v1824_v56  ;;  %v1885_v56 = vld [vmem:[#allocation4 + $0x2a0] ss:$16 sps:$4 sm:$0xff]  }
  0x69   :  { %1006 = vmatpush1.bf16.msra.mxu0 %v1819_v55  ;;  %v1890_v55 = vld [vmem:[#allocation4 + $0x2ac] ss:$16 sps:$4 sm:$0xff]  }
  0x6a   :  { %1007 = vmatprep.subr.bf16.mxu0 %v1827_v57  ;;  %1092 = vmatpush1.bf16.msra.mxu1 %v1822_v58  ;;  %v1888_v57 = vld [vmem:[#allocation4 + $0x2a8] ss:$16 sps:$4 sm:$0xff]   ;;  %v1893_v58 = vld [vmem:[#allocation4 + $0x2c4] ss:$16 sps:$4 sm:$0xff]  }
  0x6b   :  { %1093 = vmatprep.subr.bf16.mxu1 %v1830_v60  ;;  %v1891_v60 = vld [vmem:[#allocation4 + $0x2c0] ss:$16 sps:$4 sm:$0xff]  }
  0x6d   :  { %1008 = vmatpush1.bf16.msra.mxu0 %v1825_v59  ;;  %v1896_v59 = vld [vmem:[#allocation4 + $0x2cc] ss:$16 sps:$4 sm:$0xff]  }
  0x6e   :  { %1009 = vmatprep.subr.bf16.mxu0 %v1833_v61  ;;  %1094 = vmatpush1.bf16.msra.mxu1 %v1828_v62  ;;  %v1894_v61 = vld [vmem:[#allocation4 + $0x2c8] ss:$16 sps:$4 sm:$0xff]   ;;  %v1899_v62 = vld [vmem:[#allocation4 + $0x2e4] ss:$16 sps:$4 sm:$0xff]  }
  0x6f   :  { %1095 = vmatprep.subr.bf16.mxu1 %v1836_v0  ;;  %v1897_v0 = vld [vmem:[#allocation4 + $0x2e0] ss:$16 sps:$4 sm:$0xff]  }
  0x71   :  { %1010 = vmatpush1.bf16.msra.mxu0 %v1831_v63  ;;  %v1902_v63 = vld [vmem:[#allocation4 + $0x2ec] ss:$16 sps:$4 sm:$0xff]  }
  0x72   :  { %1011 = vmatprep.subr.bf16.mxu0 %v1839_v1  ;;  %1096 = vmatpush1.bf16.msra.mxu1 %v1834_v2  ;;  %v1900_v1 = vld [vmem:[#allocation4 + $0x2e8] ss:$16 sps:$4 sm:$0xff]   ;;  %v1905_v2 = vld [vmem:[#allocation4 + $0x304] ss:$16 sps:$4 sm:$0xff]  }
  0x73   :  { %1097 = vmatprep.subr.bf16.mxu1 %v1842_v4  ;;  %v1903_v4 = vld [vmem:[#allocation4 + $0x300] ss:$16 sps:$4 sm:$0xff]  }
  0x75   :  { %1012 = vmatpush1.bf16.msra.mxu0 %v1837_v3  ;;  %v1908_v3 = vld [vmem:[#allocation4 + $0x30c] ss:$16 sps:$4 sm:$0xff]  }
  0x76   :  { %1098 = vmatpush1.bf16.msra.mxu1 %v1840_v5  ;;  %1013 = vmatprep.subr.bf16.mxu0 %v1845_v6  ;;  %v1906_v5 = vld [vmem:[#allocation4 + $0x308] ss:$16 sps:$4 sm:$0xff]   ;;  %v1911_v6 = vld [vmem:[#allocation4 + $0x324] ss:$16 sps:$4 sm:$0xff]  }
  0x77   :  { %1099 = vmatprep.subr.bf16.mxu1 %v1848_v7  ;;  %v1914_v7 = vld [vmem:[#allocation4 + $0x32c] ss:$16 sps:$4 sm:$0xff]  }
  0x79   :  { %1014 = vmatpush1.bf16.msra.mxu0 %v1843_v8  ;;  %v1909_v8 = vld [vmem:[#allocation4 + $0x320] ss:$16 sps:$4 sm:$0xff]  }
  0x7a   :  { %1100 = vmatpush1.bf16.msra.mxu1 %v1846_v9  ;;  %1015 = vmatprep.subr.bf16.mxu0 %v1851_v10  ;;  %v1912_v9 = vld [vmem:[#allocation4 + $0x328] ss:$16 sps:$4 sm:$0xff]   ;;  %v1917_v10 = vld [vmem:[#allocation4 + $0x344] ss:$16 sps:$4 sm:$0xff]  }
  0x7b   :  { %1101 = vmatprep.subr.bf16.mxu1 %v1854_v11  ;;  %v1920_v11 = vld [vmem:[#allocation4 + $0x34c] ss:$16 sps:$4 sm:$0xff]  }
  0x7d   :  { %1016 = vmatpush1.bf16.msra.mxu0 %v1849_v12  ;;  %v1915_v12 = vld [vmem:[#allocation4 + $0x340] ss:$16 sps:$4 sm:$0xff]  }
  0x7e   :  { %1102 = vmatpush1.bf16.msra.mxu1 %v1852_v13  ;;  %1028 = vmatprep.subr.bf16.mxu0 %v1857_v14  ;;  %v1918_v13 = vld [vmem:[#allocation4 + $0x348] ss:$16 sps:$4 sm:$0xff]   ;;  %v1923_v14 = vld [vmem:[#allocation4 + $0x364] ss:$16 sps:$4 sm:$0xff]  }
  0x7f   :  { %1114 = vmatprep.subr.bf16.mxu1 %v1860_v15  ;;  %v1926_v15 = vld [vmem:[#allocation4 + $0x36c] ss:$16 sps:$4 sm:$0xff]  }
 0x113   :  { %v153_v16 = vpop.f32.mrb[0].mxu0 }
 0x114   :  { %v155_v17 = vpop.f32.mrb[1].mxu0  ;;  %v205_v19 = vmax.f32 %v153_v16, 0.0  ;;  %v196_v22 = vpop.f32.mrb[0].mxu1  ;;  %v1921_v16 = vld [vmem:[#allocation4 + $0x360] ss:$16 sps:$4 sm:$0xff]  }
 0x115   :  { %v157_v18 = vpop.f32.mrb[2].mxu0  ;;  %v206_v23 = vmax.f32 %v155_v17, 0.0  ;;  %v207_v25 = vmax.f32 %v196_v22, 0.0  ;;  %v198_v26 = vpop.f32.mrb[1].mxu1  ;;  %v1924_v17 = vld [vmem:[#allocation4 + $0x368] ss:$16 sps:$4 sm:$0xff]  }
 0x116   :  { %v209_v20 = vmax.f32 %v157_v18, 0.0  ;;  %v159_v21 = vpop.f32.mrb[3].mxu0  ;;  %v208_v28 = vmax.f32 %v198_v26, 0.0  ;;  %v200_v29 = vpop.f32.mrb[2].mxu1  ;;  %v1929_v18 = vld [vmem:[#allocation4 + $0x384] ss:$16 sps:$4 sm:$0xff]  }
 0x117   :  { %v210_v24 = vmax.f32 %v159_v21, 0.0  ;;  %v211_v33 = vmax.f32 %v200_v29, 0.0  ;;  %v202_v34 = vpop.f32.mrb[3].mxu1  ;;  %v1930_v21 = vld [vmem:[#allocation4 + $0x388] ss:$16 sps:$4 sm:$0xff]  }
 0x118   :  { %v213_v27 = vpack.c.bf16 %v209_v20, %v205_v19  ;;  %v212_v37 = vmax.f32 %v202_v34, 0.0  ;;  %v1932_v19 = vld [vmem:[#allocation4 + $0x38c] ss:$16 sps:$4 sm:$0xff]   ;;  %v1927_v20 = vld [vmem:[#allocation4 + $0x380] ss:$16 sps:$4 sm:$0xff]  }
 0x119   :  { %v214_v30 = vpack.c.bf16 %v210_v24, %v206_v23  ;;  %v2136_v38 = vpack.c.bf16 %v211_v33, %v207_v25  ;;  %v1935_v22 = vld [vmem:[#allocation4 + $0x3a4] ss:$16 sps:$4 sm:$0xff]   ;;  %v1938_v23 = vld [vmem:[#allocation4 + $0x3ac] ss:$16 sps:$4 sm:$0xff]   ;;  %v1933_v24 = vld [vmem:[#allocation4 + $0x3a0] ss:$16 sps:$4 sm:$0xff]  }
 0x11a   :  { %v216_v39 = vpack.c.bf16 %v212_v37, %v208_v28  ;;  %v1936_v25 = vld [vmem:[#allocation4 + $0x3a8] ss:$16 sps:$4 sm:$0xff]   ;;  %v1941_v26 = vld [vmem:[#allocation4 + $0x3c4] ss:$16 sps:$4 sm:$0xff]   ;;  %v1939_v28 = vld [vmem:[#allocation4 + $0x3c0] ss:$16 sps:$4 sm:$0xff]  }
 0x11b   :  { %1017 = vmatprep.mubr.bf16.mxu0 %v214_v30  ;;  %1103 = vmatprep.mubr.bf16.mxu1 %v214_v30  ;;  %v1942_v29 = vld [vmem:[#allocation4 + $0x3c8] ss:$16 sps:$4 sm:$0xff]   ;;  %v1947_v30 = vld [vmem:[#allocation4 + $0x3e4] ss:$16 sps:$4 sm:$0xff]  }
 0x11c   :  { %1018 = vmatmul.mubr.bf16.vlgmr.msra.gmra.mrb[4].mxu0 %v213_v27  ;;  %1104 = vmatmul.mubr.bf16.vlgmr.msra.gmra.mrb[4].mxu1 %v213_v27  ;;  %v1944_v27 = vld [vmem:[#allocation4 + $0x3cc] ss:$16 sps:$4 sm:$0xff]   ;;  %v1948_v33 = vld [vmem:[#allocation4 + $0x3e8] ss:$16 sps:$4 sm:$0xff]   ;;  %v1951_v34 = vld [vmem:[#allocation6 + $0x40] sm:$0xff]  }
 0x11d   :  { %1029 = vmatpush1.bf16.msra.mxu0 %v1855_v31  ;;  %1115 = vmatpush1.bf16.msra.mxu1 %v1858_v32  ;;  %v1950_v31 = vld [vmem:[#allocation4 + $0x3ec] ss:$16 sps:$4 sm:$0xff]   ;;  %v1945_v32 = vld [vmem:[#allocation4 + $0x3e0] ss:$16 sps:$4 sm:$0xff]  }
 0x11e   :  { %1030 = vmatprep.subr.bf16.mxu0 %v1863_v35  ;;  %1116 = vmatprep.subr.bf16.mxu1 %v1866_v36  ;;  %v1952_v35 = vld [vmem:[#allocation6 + $0xc0] sm:$0xff]  }
 0x11f   :  { %1060 = vmatprep.mubr.bf16.mxu0 %v216_v39  ;;  %1146 = vmatprep.mubr.bf16.mxu1 %v216_v39  ;;  %v1953_v36 = vld [vmem:[#allocation6] sm:$0xff]   ;;  %v1955_v39 = vld [vmem:[#allocation6 + $0x48] sm:$0xff]  }
 0x120   :  { %v1954_v37 = vld [vmem:[#allocation6 + $0x80] sm:$0xff]  }
 0x121   :  { %1031 = vmatpush1.bf16.msra.mxu0 %v1861_v40  ;;  %1117 = vmatpush1.bf16.msra.mxu1 %v1864_v41  ;;  %v1956_v40 = vld [vmem:[#allocation6 + $0xc8] sm:$0xff]  }
 0x122   :  { %1032 = vmatprep.subr.bf16.mxu0 %v1869_v42  ;;  %1118 = vmatprep.subr.bf16.mxu1 %v1872_v43  ;;  %v1957_v41 = vld [vmem:[#allocation6 + $0x8] sm:$0xff]   ;;  %v1959_v43 = vld [vmem:[#allocation6 + $0x50] sm:$0xff]  }
 0x123   :  { %v1958_v42 = vld [vmem:[#allocation6 + $0x88] sm:$0xff]  }
 0x125   :  { %1033 = vmatpush1.bf16.msra.mxu0 %v1867_v44  ;;  %1119 = vmatpush1.bf16.msra.mxu1 %v1870_v45  ;;  %v1960_v44 = vld [vmem:[#allocation6 + $0xd0] sm:$0xff]  }
 0x126   :  { %1034 = vmatprep.subr.bf16.mxu0 %v1875_v46  ;;  %1120 = vmatprep.subr.bf16.mxu1 %v1878_v47  ;;  %v1961_v45 = vld [vmem:[#allocation6 + $0x10] sm:$0xff]   ;;  %v1963_v47 = vld [vmem:[#allocation6 + $0x58] sm:$0xff]  }
 0x127   :  { %v1962_v46 = vld [vmem:[#allocation6 + $0x90] sm:$0xff]  }
 0x129   :  { %1035 = vmatpush1.bf16.msra.mxu0 %v1873_v48  ;;  %1121 = vmatpush1.bf16.msra.mxu1 %v1876_v49  ;;  %v1964_v48 = vld [vmem:[#allocation6 + $0xd8] sm:$0xff]  }
 0x12a   :  { %1036 = vmatprep.subr.bf16.mxu0 %v1881_v50  ;;  %1122 = vmatprep.subr.bf16.mxu1 %v1884_v51  ;;  %v1965_v49 = vld [vmem:[#allocation6 + $0x18] sm:$0xff]   ;;  %v1967_v50 = vld [vmem:[#allocation6 + $0x60] sm:$0xff]  }
 0x12b   :  { %v1968_v51 = vld [vmem:[#allocation6 + $0xe0] sm:$0xff]  }
 0x12d   :  { %1037 = vmatpush1.bf16.msra.mxu0 %v1879_v52  ;;  %1123 = vmatpush1.bf16.msra.mxu1 %v1882_v53  ;;  %v1969_v52 = vld [vmem:[#allocation6 + $0x20] sm:$0xff]  }
 0x12e   :  { %1038 = vmatprep.subr.bf16.mxu0 %v1887_v54  ;;  %1124 = vmatprep.subr.bf16.mxu1 %v1890_v55  ;;  %v1970_v53 = vld [vmem:[#allocation6 + $0xa0] sm:$0xff]   ;;  %v1971_v54 = vld [vmem:[#allocation6 + $0x68] sm:$0xff]  }
 0x12f   :  { %v1972_v55 = vld [vmem:[#allocation6 + $0xe8] sm:$0xff]  }
 0x131   :  { %1039 = vmatpush1.bf16.msra.mxu0 %v1885_v56  ;;  %1125 = vmatpush1.bf16.msra.mxu1 %v1888_v57  ;;  %v1973_v56 = vld [vmem:[#allocation6 + $0x28] sm:$0xff]  }
 0x132   :  { %1040 = vmatprep.subr.bf16.mxu0 %v1893_v58  ;;  %1126 = vmatprep.subr.bf16.mxu1 %v1896_v59  ;;  %v1974_v57 = vld [vmem:[#allocation6 + $0xa8] sm:$0xff]   ;;  %v1975_v58 = vld [vmem:[#allocation6 + $0x70] sm:$0xff]  }
 0x133   :  { %v1976_v59 = vld [vmem:[#allocation6 + $0xf0] sm:$0xff]  }
 0x135   :  { %1041 = vmatpush1.bf16.msra.mxu0 %v1891_v60  ;;  %1127 = vmatpush1.bf16.msra.mxu1 %v1894_v61  ;;  %v1977_v60 = vld [vmem:[#allocation6 + $0x30] sm:$0xff]  }
 0x136   :  { %1042 = vmatprep.subr.bf16.mxu0 %v1899_v62  ;;  %1128 = vmatprep.subr.bf16.mxu1 %v1902_v63  ;;  %v1978_v61 = vld [vmem:[#allocation6 + $0xb0] sm:$0xff]   ;;  %v1979_v62 = vld [vmem:[#allocation6 + $0x78] sm:$0xff]  }
 0x137   :  { %v1980_v63 = vld [vmem:[#allocation6 + $0xf8] sm:$0xff]  }
 0x139   :  { %1043 = vmatpush1.bf16.msra.mxu0 %v1897_v0  ;;  %1129 = vmatpush1.bf16.msra.mxu1 %v1900_v1  ;;  %v1981_v0 = vld [vmem:[#allocation6 + $0x38] sm:$0xff]  }
 0x13a   :  { %1044 = vmatprep.subr.bf16.mxu0 %v1905_v2  ;;  %1130 = vmatprep.subr.bf16.mxu1 %v1908_v3  ;;  %v1982_v1 = vld [vmem:[#allocation6 + $0xb8] sm:$0xff]  }
 0x13d   :  { %1045 = vmatpush1.bf16.msra.mxu0 %v1903_v4  ;;  %1131 = vmatpush1.bf16.msra.mxu1 %v1906_v5 }
 0x13e   :  { %1046 = vmatprep.subr.bf16.mxu0 %v1911_v6  ;;  %1132 = vmatprep.subr.bf16.mxu1 %v1914_v7 }
 0x141   :  { %1047 = vmatpush1.bf16.msra.mxu0 %v1909_v8  ;;  %1133 = vmatpush1.bf16.msra.mxu1 %v1912_v9 }
 0x142   :  { %1048 = vmatprep.subr.bf16.mxu0 %v1917_v10  ;;  %1134 = vmatprep.subr.bf16.mxu1 %v1920_v11 }
 0x145   :  { %1049 = vmatpush1.bf16.msra.mxu0 %v1915_v12  ;;  %1135 = vmatpush1.bf16.msra.mxu1 %v1918_v13 }
 0x146   :  { %1050 = vmatprep.subr.bf16.mxu0 %v1923_v14  ;;  %1136 = vmatprep.subr.bf16.mxu1 %v1926_v15 }
 0x149   :  { %1051 = vmatpush1.bf16.msra.mxu0 %v1921_v16  ;;  %1137 = vmatpush1.bf16.msra.mxu1 %v1924_v17 }
 0x14a   :  { %1052 = vmatprep.subr.bf16.mxu0 %v1929_v18  ;;  %1138 = vmatprep.subr.bf16.mxu1 %v1932_v19 }
 0x14d   :  { %1053 = vmatpush1.bf16.msra.mxu0 %v1927_v20  ;;  %1139 = vmatpush1.bf16.msra.mxu1 %v1930_v21 }
 0x14e   :  { %1054 = vmatprep.subr.bf16.mxu0 %v1935_v22  ;;  %1140 = vmatprep.subr.bf16.mxu1 %v1938_v23 }
 0x151   :  { %1055 = vmatpush1.bf16.msra.mxu0 %v1933_v24  ;;  %1141 = vmatpush1.bf16.msra.mxu1 %v1936_v25 }
 0x152   :  { %1056 = vmatprep.subr.bf16.mxu0 %v1941_v26  ;;  %1142 = vmatprep.subr.bf16.mxu1 %v1944_v27 }
 0x155   :  { %1057 = vmatpush1.bf16.msra.mxu0 %v1939_v28  ;;  %1143 = vmatpush1.bf16.msra.mxu1 %v1942_v29 }
 0x156   :  { %1058 = vmatprep.subr.bf16.mxu0 %v1947_v30  ;;  %1144 = vmatprep.subr.bf16.mxu1 %v1950_v31 }
 0x159   :  { %1059 = vmatpush1.bf16.msra.mxu0 %v1945_v32  ;;  %1145 = vmatpush1.bf16.msra.mxu1 %v1948_v33 }
 0x15a   :  { %1688 = vmatprep.subr.bf16.mxu0 %v1951_v34  ;;  %1710 = vmatprep.subr.bf16.mxu1 %v1952_v35 }
 0x15c   :  { %1061 = vmatmul.mubr.bf16.vlgmr.msra.gmra.mrb[4].mxu0 %v2136_v38  ;;  %1147 = vmatmul.mubr.bf16.vlgmr.msra.gmra.mrb[4].mxu1 %v2136_v38  ;;  %v1966_v38 = vld [vmem:[#allocation6 + $0x98] sm:$0xff]  }
 0x15d   :  { %1689 = vmatpush3.bf16.msra.mxu0 %v1953_v36  ;;  %1711 = vmatpush3.bf16.msra.mxu1 %v1954_v37 }
 0x15e   :  { %1690 = vmatprep.subr.bf16.mxu0 %v1955_v39  ;;  %1712 = vmatprep.subr.bf16.mxu1 %v1956_v40 }
 0x161   :  { %1691 = vmatpush3.bf16.msra.mxu0 %v1957_v41  ;;  %1713 = vmatpush3.bf16.msra.mxu1 %v1958_v42 }
 0x162   :  { %1692 = vmatprep.subr.bf16.mxu0 %v1959_v43  ;;  %1714 = vmatprep.subr.bf16.mxu1 %v1960_v44 }
 0x165   :  { %1693 = vmatpush3.bf16.msra.mxu0 %v1961_v45  ;;  %1715 = vmatpush3.bf16.msra.mxu1 %v1962_v46 }
 0x166   :  { %1694 = vmatprep.subr.bf16.mxu0 %v1963_v47  ;;  %1716 = vmatprep.subr.bf16.mxu1 %v1964_v48 }
 0x169   :  { %1695 = vmatpush3.bf16.msra.mxu0 %v1965_v49  ;;  %1717 = vmatpush3.bf16.msra.mxu1 %v1966_v38 }
 0x16a   :  { %1696 = vmatprep.subr.bf16.mxu0 %v1967_v50  ;;  %1718 = vmatprep.subr.bf16.mxu1 %v1968_v51 }
 0x16d   :  { %1697 = vmatpush3.bf16.msra.mxu0 %v1969_v52  ;;  %1719 = vmatpush3.bf16.msra.mxu1 %v1970_v53 }
 0x16e   :  { %1698 = vmatprep.subr.bf16.mxu0 %v1971_v54  ;;  %1720 = vmatprep.subr.bf16.mxu1 %v1972_v55 }
 0x171   :  { %1699 = vmatpush3.bf16.msra.mxu0 %v1973_v56  ;;  %1721 = vmatpush3.bf16.msra.mxu1 %v1974_v57 }
 0x172   :  { %1700 = vmatprep.subr.bf16.mxu0 %v1975_v58  ;;  %1722 = vmatprep.subr.bf16.mxu1 %v1976_v59 }
 0x175   :  { %1701 = vmatpush3.bf16.msra.mxu0 %v1977_v60  ;;  %1723 = vmatpush3.bf16.msra.mxu1 %v1978_v61 }
 0x176   :  { %1702 = vmatprep.subr.bf16.mxu0 %v1979_v62  ;;  %1724 = vmatprep.subr.bf16.mxu1 %v1980_v63 }
 0x179   :  { %1703 = vmatpush3.bf16.msra.mxu0 %v1981_v0  ;;  %1725 = vmatpush3.bf16.msra.mxu1 %v1982_v1 }
 0x22f   :  { %v1062_v2 = vpop.f32.mrb[4].mxu0  ;;  %v1148_v3 = vpop.f32.mrb[4].mxu1 }
 0x230   :  { %v1064_v4 = vpop.f32.mrb[5].mxu0  ;;  %v1150_v5 = vpop.f32.mrb[5].mxu1  ;;  %v1157_v8 = vmax.f32 %v1062_v2, 0.0  ;;  %v1159_v9 = vmax.f32 %v1148_v3, 0.0 }
 0x231   :  { %v1066_v6 = vpop.f32.mrb[6].mxu0  ;;  %v1152_v7 = vpop.f32.mrb[6].mxu1  ;;  %v1158_v14 = vmax.f32 %v1064_v4, 0.0  ;;  %v1160_v15 = vmax.f32 %v1150_v5, 0.0 }
 0x232   :  { %v1161_v10 = vmax.f32 %v1066_v6, 0.0  ;;  %v1163_v11 = vmax.f32 %v1152_v7, 0.0  ;;  %v1068_v12 = vpop.f32.mrb[7].mxu0  ;;  %v1154_v13 = vpop.f32.mrb[7].mxu1 }
 0x233   :  { %v1162_v16 = vmax.f32 %v1068_v12, 0.0  ;;  %v1164_v17 = vmax.f32 %v1154_v13, 0.0 }
 0x234   :  { %v1165_v18 = vpack.c.bf16 %v1161_v10, %v1157_v8  ;;  %v1167_v19 = vpack.c.bf16 %v1163_v11, %v1159_v9 }
 0x235   :  { %v1166_v20 = vpack.c.bf16 %v1162_v16, %v1158_v14  ;;  %v1168_v21 = vpack.c.bf16 %v1164_v17, %v1160_v15 }
 0x237   :  { %1457 = vmatprep.mubr.bf16.mxu0 %v1166_v20  ;;  %1498 = vmatprep.mubr.bf16.mxu1 %v1168_v21 }
 0x238   :  { %1458 = vmatmul.mubr.bf16.vlgmr.msra.gmra.mrb[8].mxu0 %v1165_v18  ;;  %1499 = vmatmul.mubr.bf16.vlgmr.msra.gmra.mrb[8].mxu1 %v1167_v19 }
 0x30b   :  { %v1704_v22 = vpop.f32.mrb[8].mxu0  ;;  %v1726_v23 = vpop.f32.mrb[8].mxu1 }
 0x30c   :  { %v1705_v24 = vpop.f32.mrb[9].mxu0  ;;  %v1727_v25 = vpop.f32.mrb[9].mxu1 }
 0x30d   :  { %v1706_v26 = vadd.f32 %v1705_v24, %v1704_v22  ;;  %v1728_v27 = vadd.f32 %v1727_v25, %v1726_v23  ;;  %v1707_v28 = vpop.f32.mrb[10].mxu0  ;;  %v1729_v29 = vpop.f32.mrb[10].mxu1 }
 0x30e   :  { %v1708_v30 = vpop.f32.mrb[11].mxu0  ;;  %v1730_v31 = vpop.f32.mrb[11].mxu1 }
 0x30f   :  { %v1501_v32 = vadd.f32 %v1728_v27, %v1706_v26  ;;  %v1709_v33 = vadd.f32 %v1708_v30, %v1707_v28  ;;  %v1731_v34 = vadd.f32 %v1730_v31, %v1729_v29 }
 0x311   :  { %1507 = vst [vmem:[%s2150_s4] sm:$0xff] %v1501_v32  ;;  %v1504_v35 = vadd.f32 %v1731_v34, %v1709_v33 }
 0x313   :  { %1508 = vst [vmem:[%s2150_s4 + $0x8] sm:$0xff] %v1504_v35 }
 0x314   :  { %1513 = vsyncpa [#allocation3], 1 }
 0x315   :  { %1514 = vsyncpa [#allocation5], 1 }

</bundles_post_ra>
